<compile_context>
chip_gen: v6e
topology: v6e:2x2x1
jax: 0.10.0
libtpu: 0.0.40
codegen_flags: <defaults>
</compile_context>

<pallas_src>
import jax
import jax.numpy as jnp
from jax.experimental import pallas as pl
from jax.experimental.pallas import tpu as pltpu


def reward_head_kernel(z_ref, a_ref, e_ref,
                       w1z_ref, w1a_ref, w1e_ref,
                       b1_ref, w2_ref, b2_ref, o_ref):
    # First layer: concat is folded into three partial matmuls (f32 accumulate).
    h = jnp.dot(z_ref[...], w1z_ref[...], preferred_element_type=jnp.float32)
    h = h + jnp.dot(a_ref[...], w1a_ref[...], preferred_element_type=jnp.float32)
    h = h + jnp.dot(e_ref[...], w1e_ref[...], preferred_element_type=jnp.float32)
    h = jnp.maximum(h + b1_ref[...], 0.0)                      # bias + ReLU (VPU)

    # Second layer (256 -> 1): VPU multiply + lane reduction instead of an
    # N=1 MXU matmul; b2 is a scalar read from SMEM.
    out = jnp.sum(h * w2_ref[...], axis=-1, keepdims=True) + b2_ref[0, 0]
    o_ref[...] = out.astype(o_ref.dtype)


def reward_head_forward(z, a, embed, params):
    """JAX wrapper mirroring RewardHead.forward(z, a, embed) -> (B,)."""
    w1z, w1a, w1e, b1, w2row, b2 = params
    B = z.shape[0]
    Dz, H = w1z.shape
    Da = w1a.shape[0]
    De = w1e.shape[0]
    D = Dz + Da + De

    # Batch tiling: small batches run as a single (8-padded) tile, large
    # batches stream in 512-row tiles with weights DMAed once (constant maps).
    if B >= 512:
        TB = 512
    else:
        TB = -(-B // 8) * 8                     # pad tiny batch up to sublane multiple
    G = -(-B // TB)
    Bp = G * TB
    if Bp != B:
        pad = Bp - B
        z = jnp.pad(z, ((0, pad), (0, 0)))
        a = jnp.pad(a, ((0, pad), (0, 0)))
        embed = jnp.pad(embed, ((0, pad), (0, 0)))

    cost = pl.CostEstimate(
        flops=2 * Bp * D * H + 2 * Bp * H,
        transcendentals=0,
        bytes_accessed=4 * (Bp * (D + 1) + D * H + 2 * H + 1),
    )

    out = pl.pallas_call(
        reward_head_kernel,
        out_shape=jax.ShapeDtypeStruct((Bp, 1), jnp.float32),
        grid_spec=pltpu.PrefetchScalarGridSpec(
            num_scalar_prefetch=0,
            grid=(G,),
            in_specs=[
                # activations: tiled over batch
                pl.BlockSpec((TB, Dz), lambda i: (i, 0)),
                pl.BlockSpec((TB, Da), lambda i: (i, 0)),
                pl.BlockSpec((TB, De), lambda i: (i, 0)),
                # weights/biases: constant index maps -> VMEM-resident, DMAed once
                pl.BlockSpec((Dz, H), lambda i: (0, 0)),
                pl.BlockSpec((Da, H), lambda i: (0, 0)),
                pl.BlockSpec((De, H), lambda i: (0, 0)),
                pl.BlockSpec((1, H), lambda i: (0, 0)),
                pl.BlockSpec((1, H), lambda i: (0, 0)),
                # b2: scalar in SMEM (no VMEM DMA, scalar add in kernel)
                pl.BlockSpec(memory_space=pltpu.MemorySpace.SMEM),
            ],
            out_specs=pl.BlockSpec((TB, 1), lambda i: (i, 0)),
        ),
        compiler_params=pltpu.CompilerParams(
            # batch tiles are independent -> shard across v7x's two TCs;
            # harmless on single-TC v5e/v6e.
            dimension_semantics=("parallel",)),
        cost_estimate=cost,
    )(z, a, embed, w1z, w1a, w1e, b1, w2row, b2)

    # Matches torch's .squeeze(-1); drop batch padding.
    return out[:B, 0]


def init_params(key, latent_dim, action_dim, embed_dim, hidden=256):
    """Deterministic synthetic init (orthogonal weights, small random biases).

    Returns W1 pre-split along its input dim so the kernel never re-slices,
    and W2 pre-reshaped to a (1, hidden) row for the VPU reduce.
    """
    D = latent_dim + action_dim + embed_dim
    k1, k2, k3, k4 = jax.random.split(key, 4)
    ortho = jax.nn.initializers.orthogonal()
    w1 = ortho(k1, (D, hidden), jnp.float32)          # stored as [in, out]
    w2 = ortho(k2, (hidden, 1), jnp.float32)
    w1z = w1[:latent_dim]
    w1a = w1[latent_dim:latent_dim + action_dim]
    w1e = w1[latent_dim + action_dim:]
    b1 = 0.1 * jax.random.normal(k3, (1, hidden), jnp.float32)
    b2 = 0.1 * jax.random.normal(k4, (1, 1), jnp.float32)
    w2row = w2.reshape(1, hidden)
    return (w1z, w1a, w1e, b1, w2row, b2)


if __name__ == "__main__":
    latent_dim, action_dim, embed_dim = 32, 8, 24
    B = 8

    key = jax.random.PRNGKey(0)
    kz, ka, ke, kp = jax.random.split(key, 4)
    z = jax.random.normal(kz, (B, latent_dim), jnp.float32)
    a = jax.random.normal(ka, (B, action_dim), jnp.float32)
    embed = jax.random.normal(ke, (B, embed_dim), jnp.float32)

    params = init_params(kp, latent_dim, action_dim, embed_dim)

    out = reward_head_forward(z, a, embed, params)
    jax.block_until_ready(out)

    # Reference check in plain JAX (same math as the torch module).
    w1z, w1a, w1e, b1, w2row, b2 = params
    x = jnp.concatenate([z, a, embed], axis=-1)
    w1 = jnp.concatenate([w1z, w1a, w1e], axis=0)
    ref = (jnp.maximum(x @ w1 + b1, 0.0) @ w2row.T + b2)[:, 0]

    assert out.shape == (B,)
    assert jnp.allclose(out, ref, atol=1e-4, rtol=1e-4), (out, ref)

    print("KERNEL_OK")
</pallas_src>

<mosaic_0001>
module attributes {stable_mosaic.version = 11 : i64} {
  func.func @reward_head_kernel(%arg0: i32, %arg1: memref<8x32xf32, #tpu.memory_space<vmem>>, %arg2: memref<8x8xf32, #tpu.memory_space<vmem>>, %arg3: memref<8x24xf32, #tpu.memory_space<vmem>>, %arg4: memref<32x256xf32, #tpu.memory_space<vmem>>, %arg5: memref<8x256xf32, #tpu.memory_space<vmem>>, %arg6: memref<24x256xf32, #tpu.memory_space<vmem>>, %arg7: memref<1x256xf32, #tpu.memory_space<vmem>>, %arg8: memref<1x256xf32, #tpu.memory_space<vmem>>, %arg9: memref<1x1xf32, #tpu.memory_space<smem>>, %arg10: memref<8x1xf32, #tpu.memory_space<vmem>>) attributes {dimension_semantics = [#tpu.dimension_semantics<parallel>], iteration_bounds = array<i64: 1>, scalar_prefetch = 0 : i64, scratch_operands = 0 : i64, tpu.core_type = #tpu.core_type<tc>, window_params = [{transform_indices = @transform_0, window_bounds = array<i64: 8, 32>}, {transform_indices = @transform_1, window_bounds = array<i64: 8, 8>}, {transform_indices = @transform_2, window_bounds = array<i64: 8, 24>}, {pipeline_mode = #tpu.pipeline_mode<synchronous>, transform_indices = @transform_3, window_bounds = array<i64: 32, 256>}, {pipeline_mode = #tpu.pipeline_mode<synchronous>, transform_indices = @transform_4, window_bounds = array<i64: 8, 256>}, {pipeline_mode = #tpu.pipeline_mode<synchronous>, transform_indices = @transform_5, window_bounds = array<i64: 24, 256>}, {pipeline_mode = #tpu.pipeline_mode<synchronous>, transform_indices = @transform_6, window_bounds = array<i64: 1, 256>}, {pipeline_mode = #tpu.pipeline_mode<synchronous>, transform_indices = @transform_7, window_bounds = array<i64: 1, 256>}, {transform_indices = @transform_8, window_bounds = array<i64: 1, 1>}, {transform_indices = @transform_9, window_bounds = array<i64: 8, 1>}]} {
    %c0 = arith.constant 0 : index
    %c0_0 = arith.constant 0 : index
    %0 = vector.load %arg1[%c0, %c0_0] : memref<8x32xf32, #tpu.memory_space<vmem>>, vector<8x32xf32>
    %c0_1 = arith.constant 0 : index
    %c0_2 = arith.constant 0 : index
    %1 = vector.load %arg4[%c0_1, %c0_2] : memref<32x256xf32, #tpu.memory_space<vmem>>, vector<32x256xf32>
    %cst = arith.constant dense<0.000000e+00> : vector<8x256xf32>
    %2 = tpu.matmul %0, %1, %cst {dimension_numbers = #tpu.dot_dimension_numbers<[1], [0], [0], [1], [0, 0, 1, 1], [], []>} : vector<8x32xf32>, vector<32x256xf32>, vector<8x256xf32> -> vector<8x256xf32>
    %c0_3 = arith.constant 0 : index
    %c0_4 = arith.constant 0 : index
    %3 = vector.load %arg2[%c0_3, %c0_4] : memref<8x8xf32, #tpu.memory_space<vmem>>, vector<8x8xf32>
    %c0_5 = arith.constant 0 : index
    %c0_6 = arith.constant 0 : index
    %4 = vector.load %arg5[%c0_5, %c0_6] : memref<8x256xf32, #tpu.memory_space<vmem>>, vector<8x256xf32>
    %cst_7 = arith.constant dense<0.000000e+00> : vector<8x256xf32>
    %5 = tpu.matmul %3, %4, %cst_7 {dimension_numbers = #tpu.dot_dimension_numbers<[1], [0], [0], [1], [0, 0, 1, 1], [], []>} : vector<8x8xf32>, vector<8x256xf32>, vector<8x256xf32> -> vector<8x256xf32>
    %6 = arith.addf %2, %5 : vector<8x256xf32>
    %c0_8 = arith.constant 0 : index
    %c0_9 = arith.constant 0 : index
    %7 = vector.load %arg3[%c0_8, %c0_9] : memref<8x24xf32, #tpu.memory_space<vmem>>, vector<8x24xf32>
    %c0_10 = arith.constant 0 : index
    %c0_11 = arith.constant 0 : index
    %8 = vector.load %arg6[%c0_10, %c0_11] : memref<24x256xf32, #tpu.memory_space<vmem>>, vector<24x256xf32>
    %cst_12 = arith.constant dense<0.000000e+00> : vector<8x256xf32>
    %9 = tpu.matmul %7, %8, %cst_12 {dimension_numbers = #tpu.dot_dimension_numbers<[1], [0], [0], [1], [0, 0, 1, 1], [], []>} : vector<8x24xf32>, vector<24x256xf32>, vector<8x256xf32> -> vector<8x256xf32>
    %10 = arith.addf %6, %9 : vector<8x256xf32>
    %c0_13 = arith.constant 0 : index
    %c0_14 = arith.constant 0 : index
    %11 = vector.load %arg7[%c0_13, %c0_14] : memref<1x256xf32, #tpu.memory_space<vmem>>, vector<1x256xf32>
    %12 = vector.broadcast %11 : vector<1x256xf32> to vector<8x256xf32>
    %13 = arith.addf %10, %12 : vector<8x256xf32>
    %cst_15 = arith.constant 0.000000e+00 : f32
    %14 = vector.broadcast %cst_15 : f32 to vector<8x256xf32>
    %15 = arith.maximumf %13, %14 : vector<8x256xf32>
    %c0_16 = arith.constant 0 : index
    %c0_17 = arith.constant 0 : index
    %16 = vector.load %arg8[%c0_16, %c0_17] : memref<1x256xf32, #tpu.memory_space<vmem>>, vector<1x256xf32>
    %17 = vector.broadcast %16 : vector<1x256xf32> to vector<8x256xf32>
    %18 = arith.mulf %15, %17 : vector<8x256xf32>
    %cst_18 = arith.constant dense<0.000000e+00> : vector<8xf32>
    %19 = vector.multi_reduction <add>, %18, %cst_18 [1] : vector<8x256xf32> to vector<8xf32>
    %20 = vector.shape_cast %19 : vector<8xf32> to vector<8x1xf32>
    %c0_19 = arith.constant 0 : index
    %c0_20 = arith.constant 0 : index
    %21 = memref.load %arg9[%c0_19, %c0_20] : memref<1x1xf32, #tpu.memory_space<smem>>
    %22 = vector.broadcast %21 : f32 to vector<8x1xf32>
    %23 = arith.addf %20, %22 : vector<8x1xf32>
    %c0_21 = arith.constant 0 : index
    %c0_22 = arith.constant 0 : index
    %24 = vector.load %arg10[%c0_21, %c0_22] : memref<8x1xf32, #tpu.memory_space<vmem>>, vector<8x1xf32>
    tpu.vector_store %arg10[%c0_21, %c0_22], %23 {strides = array<i32>} : memref<8x1xf32, #tpu.memory_space<vmem>>, vector<8x1xf32>,
    return
  }
  func.func @transform_0(%arg0: i32) -> (i32, i32) {
    %c0_i32 = arith.constant 0 : i32
    %c0_i32_0 = arith.constant 0 : i32
    return %arg0, %c0_i32 : i32, i32
  }
  func.func @transform_1(%arg0: i32) -> (i32, i32) {
    %c0_i32 = arith.constant 0 : i32
    %c0_i32_0 = arith.constant 0 : i32
    return %arg0, %c0_i32 : i32, i32
  }
  func.func @transform_2(%arg0: i32) -> (i32, i32) {
    %c0_i32 = arith.constant 0 : i32
    %c0_i32_0 = arith.constant 0 : i32
    return %arg0, %c0_i32 : i32, i32
  }
  func.func @transform_3(%arg0: i32) -> (i32, i32) {
    %c0_i32 = arith.constant 0 : i32
    %c0_i32_0 = arith.constant 0 : i32
    %c0_i32_1 = arith.constant 0 : i32
    return %c0_i32, %c0_i32_0 : i32, i32
  }
  func.func @transform_4(%arg0: i32) -> (i32, i32) {
    %c0_i32 = arith.constant 0 : i32
    %c0_i32_0 = arith.constant 0 : i32
    %c0_i32_1 = arith.constant 0 : i32
    return %c0_i32, %c0_i32_0 : i32, i32
  }
  func.func @transform_5(%arg0: i32) -> (i32, i32) {
    %c0_i32 = arith.constant 0 : i32
    %c0_i32_0 = arith.constant 0 : i32
    %c0_i32_1 = arith.constant 0 : i32
    return %c0_i32, %c0_i32_0 : i32, i32
  }
  func.func @transform_6(%arg0: i32) -> (i32, i32) {
    %c0_i32 = arith.constant 0 : i32
    %c0_i32_0 = arith.constant 0 : i32
    %c0_i32_1 = arith.constant 0 : i32
    return %c0_i32, %c0_i32_0 : i32, i32
  }
  func.func @transform_7(%arg0: i32) -> (i32, i32) {
    %c0_i32 = arith.constant 0 : i32
    %c0_i32_0 = arith.constant 0 : i32
    %c0_i32_1 = arith.constant 0 : i32
    return %c0_i32, %c0_i32_0 : i32, i32
  }
  func.func @transform_8(%arg0: i32) -> (i32, i32) {
    %c0_i32 = arith.constant 0 : i32
    %c0_i32_0 = arith.constant 0 : i32
    %c0_i32_1 = arith.constant 0 : i32
    return %c0_i32, %c0_i32_0 : i32, i32
  }
  func.func @transform_9(%arg0: i32) -> (i32, i32) {
    %c0_i32 = arith.constant 0 : i32
    %c0_i32_0 = arith.constant 0 : i32
    return %arg0, %c0_i32 : i32, i32
  }
}

</mosaic_0001>

<bundles_post_ra>
// kernel: tpu_custom_call.1
= control target key start
LH: loop header
LB: loop body
LE: loop exit
PB: predicated region body
PF: predicated region fallthrough
CT: control target
= control target key end

     0   :  { %15 = vsyncpa [#allocation4], 0  ;;  %s634_s0 = inlined_call_operand.hbm [shape: f32[8,32], index: 0, kind: input, shape index: {}]   ;;  %s635_s1 = inlined_call_operand.hbm [shape: f32[8,8], index: 1, kind: input, shape index: {}]   ;;  %s636_s2 = inlined_call_operand.hbm [shape: f32[8,24], index: 2, kind: input, shape index: {}]   ;;  %s637_s3 = inlined_call_operand.hbm [shape: f32[32,256], index: 3, kind: input, shape index: {}]   ;;  %s638_s4 = inlined_call_operand.hbm [shape: f32[8,256], index: 4, kind: input, shape index: {}]   ;;  %s639_s5 = inlined_call_operand.hbm [shape: f32[24,256], index: 5, kind: input, shape index: {}]   ;;  %s640_s6 = inlined_call_operand.vmem [shape: f32[1,256], index: 6, kind: input, shape index: {}]   ;;  %s641_s7 = inlined_call_operand.vmem [shape: f32[1,256], index: 7, kind: input, shape index: {}]   ;;  %s642_s8 = inlined_call_operand.<no memory space> [shape: f32[1,1], index: 8, kind: input, shape index: {}]   ;;  %s643_s9 = inlined_call_operand.vmem [shape: f32[8,1], index: 9, kind: output, shape index: {}]  }
   0x1   :  { %16 = vsyncpa [#allocation6], 0 }
   0x2   :  { %17 = vsyncpa [#allocation9], 0 }
   0x3   :  { %18 = vsyncpa [#allocation12], 0  ;;  %s539_s30 = smov [#allocation5]   ;;  %s540_s11 = smov [#allocation8]  }
   0x4   :  { %s35_s10 = sshll.u32 %s539_s30, 4  ;;  %s54_s12 = sshll.u32 %s540_s11, 4  ;;  %s36_s10 = int_to_ptr.vmem [resolvable:$true] %s35_s10  ;;  %s55_s12 = int_to_ptr.vmem [resolvable:$true] %s54_s12 }
   0x5   :  { %s419_s13 = scalar_lea.vmem %s36_s10, 128  ;;  %p424_p1 = scmp.lt.s32.totalorder %s36_s10, %s36_s10 }
   0x6   :  { %p420_p0 = scmp.ne.s32.totalorder %s36_s10, %s419_s13  ;;  %p425_p2 = scmp.lt.s32.totalorder %s419_s13, %s419_s13 }
   0x8   :  { %p426_p3 = por %p425_p2, %p424_p1 }
   0xa   :  { %p427_p4 = pnand %p426_p3, %p420_p0 }
   0xc   :  { %430 = shalt.err (!%p427_p4)
}
   0xd   :  { %38 = dma.hbm_to_vmem [thread:$0]  %s635_s1, 128, %s36_s10, [#allocation6]  }
   0xe   :  { %s439_s16 = scalar_lea.vmem %s55_s12, 1024  ;;  %p444_p6 = scmp.lt.s32.totalorder %s55_s12, %s55_s12 }
   0xf   :  { %p440_p5 = scmp.ne.s32.totalorder %s55_s12, %s439_s16  ;;  %p445_p7 = scmp.lt.s32.totalorder %s439_s16, %s439_s16 }
  0x11   :  { %p446_p8 = por %p445_p7, %p444_p6 }
  0x13   :  { %p447_p9 = pnand %p446_p8, %p440_p5 }
  0x15   :  { %450 = shalt.err (!%p447_p9)
}
  0x16   :  { %s541_s17 = smov 256   ;;  %s542_s18 = smov 16  }
  0x17   :  { %60 = dma.hbm_to_vmem [thread:$0]  %s637_s3, 1024, %s55_s12, [#allocation9], %s541_s17, %s541_s17, %s542_s18  }
  0x18   :  { %s543_s21 = smov [#allocation3]   ;;  %s544_s23 = smov [#allocation7]  }
  0x19   :  { %s25_s22 = sshll.u32 %s543_s21, 4  ;;  %s45_s1 = sshll.u32 %s544_s23, 4  ;;  %s26_s22 = int_to_ptr.vmem [resolvable:$true] %s25_s22  ;;  %s46_s1 = int_to_ptr.vmem [resolvable:$true] %s45_s1 }
  0x1a   :  { %s459_s24 = scalar_lea.vmem %s26_s22, 128  ;;  %p464_p11 = scmp.lt.s32.totalorder %s26_s22, %s26_s22 }
  0x1b   :  { %p460_p10 = scmp.ne.s32.totalorder %s26_s22, %s459_s24  ;;  %p465_p12 = scmp.lt.s32.totalorder %s459_s24, %s459_s24 }
  0x1d   :  { %p466_p13 = por %p465_p12, %p464_p11 }
  0x1f   :  { %p467_p0 = pnand %p466_p13, %p460_p10 }
  0x21   :  { %470 = shalt.err (!%p467_p0)
}
  0x22   :  { %28 = dma.hbm_to_vmem [thread:$0]  %s634_s0, 128, %s26_s22, [#allocation4]  }
  0x23   :  { %s479_s27 = scalar_lea.vmem %s46_s1, 128  ;;  %p484_p2 = scmp.lt.s32.totalorder %s46_s1, %s46_s1 }
  0x24   :  { %p480_p1 = scmp.ne.s32.totalorder %s46_s1, %s479_s27  ;;  %p485_p3 = scmp.lt.s32.totalorder %s479_s27, %s479_s27 }
  0x26   :  { %p486_p4 = por %p485_p3, %p484_p2 }
  0x28   :  { %p487_p5 = pnand %p486_p4, %p480_p1 }
  0x2a   :  { %490 = shalt.err (!%p487_p5)
}
  0x2b   :  { %48 = dma.hbm_to_vmem [thread:$0]  %s636_s2, 128, %s46_s1, [#allocation6]  }
  0x2c   :  { %s545_s29 = smov [#allocation10]   ;;  %s546_s10 = smov [#allocation11]  }
  0x2d   :  { %s67_s30 = sshll.u32 %s545_s29, 4  ;;  %s76_s11 = sshll.u32 %s546_s10, 4  ;;  %s68_s30 = int_to_ptr.vmem [resolvable:$true] %s67_s30  ;;  %s77_s11 = int_to_ptr.vmem [resolvable:$true] %s76_s11 }
  0x2e   :  { %s499_s12 = scalar_lea.vmem %s68_s30, 256  ;;  %p504_p7 = scmp.lt.s32.totalorder %s68_s30, %s68_s30 }
  0x2f   :  { %p500_p6 = scmp.ne.s32.totalorder %s68_s30, %s499_s12  ;;  %p505_p8 = scmp.lt.s32.totalorder %s499_s12, %s499_s12 }
  0x31   :  { %p506_p9 = por %p505_p8, %p504_p7 }
  0x33   :  { %p507_p10 = pnand %p506_p9, %p500_p6 }
  0x35   :  { %510 = shalt.err (!%p507_p10)
}
  0x36   :  { %70 = dma.hbm_to_vmem [thread:$0]  %s638_s4, 256, %s68_s30, [#allocation9]  }
  0x37   :  { %s519_s14 = scalar_lea.vmem %s77_s11, 768  ;;  %p524_p12 = scmp.lt.s32.totalorder %s77_s11, %s77_s11 }
  0x38   :  { %p520_p11 = scmp.ne.s32.totalorder %s77_s11, %s519_s14  ;;  %p525_p13 = scmp.lt.s32.totalorder %s519_s14, %s519_s14 }
  0x3a   :  { %p526_p0 = por %p525_p13, %p524_p12 }
  0x3c   :  { %p527_p1 = pnand %p526_p0, %p520_p11 }
  0x3e   :  { %530 = shalt.err (!%p527_p1)
}
  0x3f   :  { %82 = dma.hbm_to_vmem [thread:$0]  %s639_s5, 768, %s77_s11, [#allocation12], %s541_s17, %s541_s17, %s542_s18  }
  0x40   :  { %531 = dma.done.wait [#allocation4], 128  }
  0x41   :  { %532 = vsyncadd [#allocation4], 4294967168 }
  0x42   :  { %533 = dma.done.wait [#allocation6], 256  }
  0x43   :  { %534 = vsyncadd [#allocation6], 4294967040 }
  0x44   :  { %535 = dma.done.wait [#allocation9], 1280  }
  0x45   :  { %536 = vsyncadd [#allocation9], 4294966016 }
  0x46   :  { %537 = dma.done.wait [#allocation12], 768  }
  0x47   :  { %538 = vsyncadd [#allocation12], 4294966528  ;;  %v547_v0 = vmov 0.0   ;;  %v118_v1 = vld [vmem:[#allocation10 + $0x8] sm:$0xff]  ;;  %v115_v2 = vld [vmem:[#allocation8 + $0x38] sm:$0xff]  ;;  %vm119_vm0 = vcmask 64512   ;;  %v355_v20 = vlaneseq  ;;  %v387_v47 = vstv %s642_s8 }
  0x48   :  { %187 = vmatprep.mubr.f32.mxu0 %v547_v0  ;;  %262 = vmatprep.mubr.f32.mxu1 %v547_v0  ;;  %v117_v3 = vld [vmem:[#allocation10] sm:$0xff]  ;;  %v114_v4 = vld [vmem:[#allocation8 + $0x30] sm:$0xff]  ;;  %v113_v5 = vld [vmem:[#allocation8 + $0x28] sm:$0xff]  ;;  %vm194_vm1 = vcmask 261120   ;;  %vm276_vm2 = vcmask 195584   ;;  %vm389_vm3 = vcmask 7168  }
  0x49   :  { %153 = vmatprep.subr.mxu0 %v118_v1  ;;  %222 = vmatprep.subr.mxu1 %v115_v2  ;;  %v275_v6 = vld [vmem:[#allocation11 + $0x28] sm:$0xff]  ;;  %v116_v7 = vld [vmem:[#allocation5] sm:$0xff]  ;;  %v112_v8 = vld [vmem:[#allocation8 + $0x20] sm:$0xff]  ;;  %v356_v21 = vshrl.u32 %v355_v20, 7 }
  0x4a   :  { %154 = vmatpush1.msra.mxu0 %v117_v3  ;;  %223 = vmatpush1.msra.mxu1 %v114_v4  ;;  %v274_v9 = vld [vmem:[#allocation11 + $0x20] sm:$0xff]  ;;  %v111_v10 = vld [vmem:[#allocation8 + $0x18] sm:$0xff]  ;;  %v273_v11 = vld [vmem:[#allocation11 + $0x18] sm:$0xff] }
  0x4b   :  { %224 = vmatprep.subr.mxu1 %v113_v5  ;;  %306 = vmatprep.subr.mxu0 %v275_v6  ;;  %v110_v12 = vld [vmem:[#allocation8 + $0x10] sm:$0xff]  ;;  %v272_v13 = vld [vmem:[#allocation11 + $0x10] sm:$0xff]  ;;  %v109_v14 = vld [vmem:[#allocation8 + $0x8] sm:$0xff]  ;;  %v357_v24 = vsub.s32 0, %v356_v21  ;;  %v361_v26 = vsub.s32 1, %v356_v21 }
  0x4c   :  { %399 = vmatmul.mubr.msk.f32.vlgmr.msra.gmra.mxu0 %vm119_vm0, %v116_v7  ;;  %225 = vmatpush1.msra.mxu1 %v112_v8  ;;  %v271_v15 = vld [vmem:[#allocation11 + $0x8] sm:$0xff]  ;;  %v108_v16 = vld [vmem:[#allocation8] sm:$0xff]  ;;  %v270_v17 = vld [vmem:[#allocation11] sm:$0xff] }
  0x4d   :  { %307 = vmatpush1.msra.mxu0 %v274_v9  ;;  %226 = vmatprep.subr.mxu1 %v111_v10  ;;  %v107_v18 = vld [vmem:[#allocation3] sm:$0xff]  ;;  %v269_v19 = vld [vmem:[#allocation7] sm:$0xff] }
  0x4e   :  { %308 = vmatprep.subr.mxu0 %v273_v11  ;;  %227 = vmatpush1.msra.mxu1 %v110_v12  ;;  %v353_v25 = vld [vmem:[%s640_s6] sm:$0x3] }
  0x4f   :  { %309 = vmatpush1.msra.mxu0 %v272_v13  ;;  %228 = vmatprep.subr.mxu1 %v109_v14  ;;  %v358_v30 = vrot.slane %v353_v25, %v357_v24  ;;  %v362_v34 = vrot.slane %v353_v25, %v361_v26  ;;  %v369_v36 = vld [vmem:[%s641_s7] sm:$0x3] }
  0x50   :  { %310 = vmatprep.subr.mxu0 %v271_v15  ;;  %229 = vmatpush1.msra.mxu1 %v108_v16  ;;  %v374_v41 = vrot.slane %v369_v36, %v357_v24  ;;  %v378_v42 = vrot.slane %v369_v36, %v361_v26 }
  0x51   :  { %311 = vmatpush1.msra.mxu0 %v270_v17  ;;  %344 = vmatprep.mubr.f32.mxu0 %v547_v0 }
  0x52   :  { %400 = vmatmul.mubr.msk.f32.vlgmr.msra.gmra.mxu1 %vm194_vm1, %v107_v18  ;;  %401 = vmatmul.mubr.msk.f32.vlgmr.msra.gmra.mxu0 %vm276_vm2, %v269_v19 }
 0x10c   :  { %v189_v22 = vpop.f32.mrf.mxu0 }
 0x10e   :  { %v191_v23 = vpop.f32.mrf.mxu0 }
 0x112   :  { %v264_v27 = vpop.f32.mrf.mxu1  ;;  %v346_v28 = vpop.f32.mrf.mxu0 }
 0x113   :  { %v265_v29 = vadd.f32 %v264_v27, %v189_v22 }
 0x114   :  { %v266_v31 = vpop.f32.mrf.mxu1  ;;  %v348_v35 = vpop.f32.mrf.mxu0 }
 0x115   :  { %v351_v32 = vadd.f32 %v346_v28, %v265_v29  ;;  %v267_v33 = vadd.f32 %v266_v31, %v191_v23 }
 0x117   :  { %v365_v37 = vadd.f32 %v358_v30, %v351_v32  ;;  %v352_v38 = vadd.f32 %v348_v35, %v267_v33 }
 0x119   :  { %v367_v39 = vmax.f32 %v365_v37, 0.0  ;;  %v366_v40 = vadd.f32 %v362_v34, %v352_v38 }
 0x11b   :  { %v368_v43 = vmax.f32 %v366_v40, 0.0  ;;  %v381_v44 = vmul.f32 %v374_v41, %v367_v39 }
 0x11d   :  { %v382_v45 = vmul.f32 %v378_v42, %v368_v43 }
 0x11f   :  { %v383_v46 = vadd.f32 %v382_v45, %v381_v44 }
 0x121   :  { %384 = vadd.xlane.f32.xlu0 %v383_v46 }
 0x1aa   :  { %v385_v48 = vpop.xlane.xlu0 %384 }
 0x1ab   :  { %v388_v49 = vadd.f32 %v387_v47, %v385_v48 }
 0x1ad   :  { %390 = vst.msk [vmem:[%s643_s9] sm:$0xff] %vm389_vm3, %v388_v49 }
 0x1ae   :  { %395 = vsyncpa [#allocation4], 1 }
 0x1af   :  { %396 = vsyncpa [#allocation6], 1 }
 0x1b0   :  { %397 = vsyncpa [#allocation9], 1 }
 0x1b1   :  { %398 = vsyncpa [#allocation12], 1 }

</bundles_post_ra>
